<compile_context>
chip_gen: v7x
topology: tpu7x:2x2x1
jax: 0.10.0
libtpu: 0.0.40
codegen_flags: <defaults>
</compile_context>

<pallas_src>
import functools

import jax
import jax.numpy as jnp
from jax.experimental import pallas as pl
from jax.experimental.pallas import tpu as pltpu

_LANES = 128
_DEFAULT_TM = 8192          # unfolded rows per grid step (hint)
_MAX_TM = 16384             # hard cap so VMEM stays well under 32 MiB / v7x 64 MiB


def _cdiv(a, b):
    return -(-a // b)


def _round_up(a, b):
    return _cdiv(a, b) * b


def _fold_factor(C):
    """Rows folded into one lane-dense output row (r*C <= 128, weights stay small)."""
    return max(1, min(_LANES // C, 16))


def _choose_block_rows(mf, target_bf):
    """Folded rows per grid step.

    Declared block row counts are either the full folded extent (tiny inputs)
    or a multiple of 32 (native (32,128) tiling of the int8 preds output).
    For larger inputs we keep >= 2 grid steps so the 'parallel' axis can shard
    across both v7x TensorCores.
    """
    if mf <= 64:
        return mf
    bf = min(_round_up(max(target_bf, 1), 32), _round_up(_cdiv(mf, 2), 32))
    return max(32, bf)


def _mlp_classifier_kernel(x_ref, w1_ref, b1_ref, w2_ref, b2_ref,
                           logits_ref, probs_ref, preds_ref):
    """Fused 2-layer MLP + sigmoid + threshold over one folded row tile.

    bf = folded rows per step, r = rows folded per 128-lane row:
      x_ref   (bf, r*D)   input dtype, cast to bf16 here
      w1_ref  (r*D, r*H)  bf16 block-diagonal kron(I_r, W1)   (VMEM resident)
      b1_ref  (1, r*H)    f32 tiled bias
      w2_ref  (r*H, r*C)  bf16 block-diagonal kron(I_r, W2)   (VMEM resident)
      b2_ref  (1, r*C)    f32 tiled bias
      outputs (bf, r*C)   lane-dense: logits f32, probs f32, preds int8
    """
    x = x_ref[...].astype(jnp.bfloat16)
    h = jnp.dot(x, w1_ref[...], preferred_element_type=jnp.float32)
    h = jnp.maximum(h + b1_ref[...], 0.0)
    # TODO(synk): dropout between layers is omitted (inference / eval mode).
    logits = jnp.dot(h.astype(jnp.bfloat16), w2_ref[...],
                     preferred_element_type=jnp.float32) + b2_ref[...]
    logits_ref[...] = logits
    probs_ref[...] = 1.0 / (1.0 + jnp.exp(-logits))
    preds_ref[...] = jnp.where(logits > 0.0, 1.0, 0.0).astype(jnp.int8)


@functools.partial(jax.jit, static_argnames=("tm",))
def _forward_2d(x, w1, b1, w2, b2, *, tm=_DEFAULT_TM):
    """x: (M, D) any float dtype.  Returns (M, C) f32 logits / f32 probs / bool preds."""
    M, D = x.shape
    H = w1.shape[1]
    C = w2.shape[1]
    r = _fold_factor(C)

    # Only wrapper-side copy of the features: pad by <= r-1 zero rows when the
    # row count isn't a multiple of the fold factor (rare).  Otherwise the
    # (M, D) -> (M//r, r*D) fold is a free row-major reshape of a contiguous
    # array and the f32 features stream straight into the kernel.
    m_pad = _round_up(M, r)
    if m_pad != M:
        x = jnp.pad(x, ((0, m_pad - M), (0, 0)))
    mf = m_pad // r
    xf = x.reshape(mf, r * D)

    # Block-diagonal weights: kron(I_r, W) turns the per-row MLP into a
    # lane-dense MLP over folded rows.  For r=8, D=32, H=128, C=16 this is
    # ~0.75 MiB of bf16 weights, grid-invariant and VMEM-resident.
    eye = jnp.eye(r, dtype=jnp.float32)
    w1b = jnp.kron(eye, w1.astype(jnp.float32)).astype(jnp.bfloat16)
    w2b = jnp.kron(eye, w2.astype(jnp.float32)).astype(jnp.bfloat16)
    b1b = jnp.tile(b1.reshape(1, H).astype(jnp.float32), (1, r))
    b2b = jnp.tile(b2.reshape(1, C).astype(jnp.float32), (1, r))

    tm_eff = min(int(tm), _MAX_TM)
    bf = _choose_block_rows(mf, _cdiv(max(tm_eff, r), r))
    grid = (_cdiv(mf, bf),)

    out_f32 = jax.ShapeDtypeStruct((mf, r * C), jnp.float32)
    out_i8 = jax.ShapeDtypeStruct((mf, r * C), jnp.int8)
    row_map = lambda i: (i, 0)
    const_map = lambda i: (0, 0)

    cost = pl.CostEstimate(
        flops=2 * m_pad * (D * H + H * C),
        transcendentals=m_pad * C,
        bytes_accessed=(xf.size * xf.dtype.itemsize
                        + w1b.size * w1b.dtype.itemsize
                        + w2b.size * w2b.dtype.itemsize
                        + (b1b.size + b2b.size) * 4
                        + m_pad * C * (4 + 4 + 1)),
    )

    logits_f, probs_f, preds_f = pl.pallas_call(
        _mlp_classifier_kernel,
        out_shape=(out_f32, out_f32, out_i8),
        grid_spec=pltpu.PrefetchScalarGridSpec(
            num_scalar_prefetch=0,
            grid=grid,
            in_specs=[
                pl.BlockSpec((bf, r * D), row_map),        # folded feature rows
                pl.BlockSpec((r * D, r * H), const_map),   # W1 block-diag (resident)
                pl.BlockSpec((1, r * H), const_map),       # b1 tiled
                pl.BlockSpec((r * H, r * C), const_map),   # W2 block-diag (resident)
                pl.BlockSpec((1, r * C), const_map),       # b2 tiled
            ],
            out_specs=(
                pl.BlockSpec((bf, r * C), row_map),        # logits (lane-dense)
                pl.BlockSpec((bf, r * C), row_map),        # probs  (lane-dense)
                pl.BlockSpec((bf, r * C), row_map),        # preds  (int8, lane-dense)
            ),
        ),
        compiler_params=pltpu.CompilerParams(
            # Row-tile axis is embarrassingly parallel -> shards across both v7x TCs.
            dimension_semantics=("parallel",),
            # Per-step footprint at bf=1024: ~13 MiB (x 2 MiB dbl-buffered,
            # outputs ~2.3 MiB, weights ~1.5 MiB, f32 temporaries ~7 MiB).
            # 32 MiB fits every generation, incl. v7x's 64 MiB physical VMEM.
            vmem_limit_bytes=32 * 1024 * 1024,
        ),
        cost_estimate=cost,
    )(xf, w1b, b1b, w2b, b2b)

    # Undo the lane fold: free row-major reshapes; the [:M] slice only copies
    # (and fuses with the dtype convert) in the rare padded case.
    logits = logits_f.reshape(m_pad, C)[:M]
    probs = probs_f.reshape(m_pad, C)[:M]
    preds = preds_f.reshape(m_pad, C)[:M] != 0
    return logits, probs, preds


def observation_classifier_forward(features, params, observation_class_names,
                                   trained_observation_names, tm=_DEFAULT_TM):
    """JAX/Pallas equivalent of ObservationClassifier.forward (identity-mapping path)."""
    assert features.ndim >= 2
    *dims, D = features.shape
    C = len(observation_class_names)
    w1, b1, w2, b2 = params
    assert w1.shape[0] == D and w2.shape[1] == C

    if list(observation_class_names) != list(trained_observation_names):
        # TODO(synk): cross-dataset observation mapping needs the
        # observation_mappings.csv resource (file I/O) -- not implemented.
        raise NotImplementedError("observation class remapping not supported")

    x = features.reshape(-1, D)          # metadata-only reshape, no copy
    logits, probs, preds = _forward_2d(x, w1, b1, w2, b2, tm=int(tm))
    return (logits.reshape(*dims, C),
            probs.reshape(*dims, C),
            preds.reshape(*dims, C))


def init_params(key, d, d_hidden, n_classes):
    """Deterministic synthetic parameters (shapes from ObservationClassifier.__init__)."""
    k1, k2, k3, k4 = jax.random.split(key, 4)
    w1 = jax.random.normal(k1, (d, d_hidden), jnp.float32) * (1.0 / jnp.sqrt(d))
    b1 = jax.random.normal(k2, (1, d_hidden), jnp.float32) * 0.01
    w2 = jax.random.normal(k3, (d_hidden, n_classes), jnp.float32) * (1.0 / jnp.sqrt(d_hidden))
    b2 = jax.random.normal(k4, (1, n_classes), jnp.float32) * 0.01
    return w1, b1, w2, b2


if __name__ == "__main__":
    # Module hyperparameters: n_cls_hidden_layers=1 (one hidden layer), d=32,
    # d_classifier_hidden=128, act='relu', dropout ignored at inference,
    # 16 learned observation names.
    d, d_hidden, n_classes = 32, 128, 16
    observation_names = [f"set/obs_{i}" for i in range(n_classes)]

    key = jax.random.PRNGKey(0)
    k_feat, k_feat2, k_param = jax.random.split(key, 3)
    params = init_params(k_param, d, d_hidden, n_classes)
    w1, b1, w2, b2 = params

    def reference(feats):
        xf = feats.reshape(-1, d).astype(jnp.float32)
        ref32 = jnp.maximum(xf @ w1 + b1, 0.0) @ w2 + b2                    # f32 path
        xb = xf.astype(jnp.bfloat16)                                        # bf16-matched path
        hb = jnp.maximum(jnp.dot(xb, w1.astype(jnp.bfloat16),
                                 preferred_element_type=jnp.float32) + b1, 0.0)
        refb = jnp.dot(hb.astype(jnp.bfloat16), w2.astype(jnp.bfloat16),
                       preferred_element_type=jnp.float32) + b2
        return ref32, refb

    # --- case 1: (N x C x d) = (2, 16, 32); M=32 -> single full-extent block ---
    features = jax.random.normal(k_feat, (2, n_classes, d), jnp.float32)
    logits, probs, preds = observation_classifier_forward(
        features, params, observation_names, observation_names)
    jax.block_until_ready((logits, probs, preds))

    ref32, refb = reference(features)
    assert logits.shape == (2, n_classes, n_classes) and logits.dtype == jnp.float32
    assert probs.shape == (2, n_classes, n_classes) and probs.dtype == jnp.float32
    assert preds.shape == (2, n_classes, n_classes) and preds.dtype == jnp.bool_
    lf = logits.reshape(-1, n_classes)
    assert jnp.allclose(lf, refb, atol=1e-2)                  # same bf16 quantization
    assert jnp.allclose(lf, ref32, atol=1e-1)                 # vs full-f32 reference
    assert jnp.allclose(probs.reshape(-1, n_classes), jax.nn.sigmoid(lf), atol=1e-5)
    assert jnp.array_equal(preds, logits > 0.0)
    safe = jnp.abs(refb) > 2e-2                               # avoid sign flips at ~0
    assert bool(jnp.all(jnp.where(safe, preds.reshape(-1, n_classes) == (refb > 0), True)))

    # --- case 2: (N x A x C x d), ragged M=2125 -> row pad(3), 2 grid steps,
    #             partial last block ------------------------------------------
    features2 = jax.random.normal(k_feat2, (5, 25, 17, d), jnp.float32)
    logits2, probs2, preds2 = observation_classifier_forward(
        features2, params, observation_names, observation_names)
    jax.block_until_ready((logits2, probs2, preds2))
    ref32_2, refb_2 = reference(features2)
    assert logits2.shape == (5, 25, 17, n_classes)
    assert jnp.allclose(logits2.reshape(-1, n_classes), refb_2, atol=1e-2)
    assert jnp.allclose(logits2.reshape(-1, n_classes), ref32_2, atol=1e-1)
    assert jnp.allclose(probs2, jax.nn.sigmoid(logits2), atol=1e-5)
    assert preds2.dtype == jnp.bool_ and jnp.array_equal(preds2, logits2 > 0.0)

    print("KERNEL_OK")
</pallas_src>

<mosaic_0001>
module attributes {stable_mosaic.version = 11 : i64} {
  func.func @_mlp_classifier_kernel(%arg0: i32, %arg1: memref<4x256xf32, #tpu.memory_space<vmem>>, %arg2: memref<256x1024xbf16, #tpu.memory_space<vmem>>, %arg3: memref<1x1024xf32, #tpu.memory_space<vmem>>, %arg4: memref<1024x128xbf16, #tpu.memory_space<vmem>>, %arg5: memref<1x128xf32, #tpu.memory_space<vmem>>, %arg6: memref<4x128xf32, #tpu.memory_space<vmem>>, %arg7: memref<4x128xf32, #tpu.memory_space<vmem>>, %arg8: memref<4x128xi8, #tpu.memory_space<vmem>>) attributes {dimension_semantics = [#tpu.dimension_semantics<parallel>], iteration_bounds = array<i64: 1>, scalar_prefetch = 0 : i64, scratch_operands = 0 : i64, tpu.core_type = #tpu.core_type<tc>, window_params = [{transform_indices = @transform_0, window_bounds = array<i64: 4, 256>}, {pipeline_mode = #tpu.pipeline_mode<synchronous>, transform_indices = @transform_1, window_bounds = array<i64: 256, 1024>}, {pipeline_mode = #tpu.pipeline_mode<synchronous>, transform_indices = @transform_2, window_bounds = array<i64: 1, 1024>}, {pipeline_mode = #tpu.pipeline_mode<synchronous>, transform_indices = @transform_3, window_bounds = array<i64: 1024, 128>}, {pipeline_mode = #tpu.pipeline_mode<synchronous>, transform_indices = @transform_4, window_bounds = array<i64: 1, 128>}, {transform_indices = @transform_5, window_bounds = array<i64: 4, 128>}, {transform_indices = @transform_6, window_bounds = array<i64: 4, 128>}, {transform_indices = @transform_7, window_bounds = array<i64: 4, 128>}]} {
    %c0 = arith.constant 0 : index
    %c0_0 = arith.constant 0 : index
    %0 = vector.load %arg1[%c0, %c0_0] : memref<4x256xf32, #tpu.memory_space<vmem>>, vector<4x256xf32>
    %1 = arith.truncf %0 : vector<4x256xf32> to vector<4x256xbf16>
    %c0_1 = arith.constant 0 : index
    %c0_2 = arith.constant 0 : index
    %2 = vector.load %arg2[%c0_1, %c0_2] : memref<256x1024xbf16, #tpu.memory_space<vmem>>, vector<256x1024xbf16>
    %cst = arith.constant dense<0.000000e+00> : vector<4x1024xf32>
    %3 = tpu.matmul %1, %2, %cst {dimension_numbers = #tpu.dot_dimension_numbers<[1], [0], [0], [1], [0, 0, 1, 1], [], []>} : vector<4x256xbf16>, vector<256x1024xbf16>, vector<4x1024xf32> -> vector<4x1024xf32>
    %c0_3 = arith.constant 0 : index
    %c0_4 = arith.constant 0 : index
    %4 = vector.load %arg3[%c0_3, %c0_4] : memref<1x1024xf32, #tpu.memory_space<vmem>>, vector<1x1024xf32>
    %5 = vector.broadcast %4 : vector<1x1024xf32> to vector<4x1024xf32>
    %6 = arith.addf %3, %5 : vector<4x1024xf32>
    %cst_5 = arith.constant 0.000000e+00 : f32
    %7 = vector.broadcast %cst_5 : f32 to vector<4x1024xf32>
    %8 = arith.maximumf %6, %7 : vector<4x1024xf32>
    %9 = arith.truncf %8 : vector<4x1024xf32> to vector<4x1024xbf16>
    %c0_6 = arith.constant 0 : index
    %c0_7 = arith.constant 0 : index
    %10 = vector.load %arg4[%c0_6, %c0_7] : memref<1024x128xbf16, #tpu.memory_space<vmem>>, vector<1024x128xbf16>
    %cst_8 = arith.constant dense<0.000000e+00> : vector<4x128xf32>
    %11 = tpu.matmul %9, %10, %cst_8 {dimension_numbers = #tpu.dot_dimension_numbers<[1], [0], [0], [1], [0, 0, 1, 1], [], []>} : vector<4x1024xbf16>, vector<1024x128xbf16>, vector<4x128xf32> -> vector<4x128xf32>
    %c0_9 = arith.constant 0 : index
    %c0_10 = arith.constant 0 : index
    %12 = vector.load %arg5[%c0_9, %c0_10] : memref<1x128xf32, #tpu.memory_space<vmem>>, vector<1x128xf32>
    %13 = vector.broadcast %12 : vector<1x128xf32> to vector<4x128xf32>
    %14 = arith.addf %11, %13 : vector<4x128xf32>
    %c0_11 = arith.constant 0 : index
    %c0_12 = arith.constant 0 : index
    %15 = vector.load %arg6[%c0_11, %c0_12] : memref<4x128xf32, #tpu.memory_space<vmem>>, vector<4x128xf32>
    tpu.vector_store %arg6[%c0_11, %c0_12], %14 {strides = array<i32>} : memref<4x128xf32, #tpu.memory_space<vmem>>, vector<4x128xf32>,
    %cst_13 = arith.constant 0.000000e+00 : f32
    %16 = vector.broadcast %cst_13 : f32 to vector<4x128xf32>
    %17 = arith.subf %16, %14 : vector<4x128xf32>
    %18 = math.exp %17 : vector<4x128xf32>
    %cst_14 = arith.constant 1.000000e+00 : f32
    %19 = vector.broadcast %cst_14 : f32 to vector<4x128xf32>
    %20 = arith.addf %19, %18 : vector<4x128xf32>
    %cst_15 = arith.constant 1.000000e+00 : f32
    %21 = vector.broadcast %cst_15 : f32 to vector<4x128xf32>
    %22 = arith.divf %21, %20 : vector<4x128xf32>
    %c0_16 = arith.constant 0 : index
    %c0_17 = arith.constant 0 : index
    %23 = vector.load %arg7[%c0_16, %c0_17] : memref<4x128xf32, #tpu.memory_space<vmem>>, vector<4x128xf32>
    tpu.vector_store %arg7[%c0_16, %c0_17], %22 {strides = array<i32>} : memref<4x128xf32, #tpu.memory_space<vmem>>, vector<4x128xf32>,
    %cst_18 = arith.constant 0.000000e+00 : f32
    %24 = vector.broadcast %cst_18 : f32 to vector<4x128xf32>
    %25 = arith.cmpf ogt, %14, %24 : vector<4x128xf32>
    %cst_19 = arith.constant 1.000000e+00 : f32
    %cst_20 = arith.constant 0.000000e+00 : f32
    %26 = vector.broadcast %cst_19 : f32 to vector<4x128xf32>
    %27 = vector.broadcast %cst_20 : f32 to vector<4x128xf32>
    %28 = arith.select %25, %26, %27 : vector<4x128xi1>, vector<4x128xf32>
    %29 = arith.fptosi %28 : vector<4x128xf32> to vector<4x128xi8>
    %c0_21 = arith.constant 0 : index
    %c0_22 = arith.constant 0 : index
    %30 = vector.load %arg8[%c0_21, %c0_22] : memref<4x128xi8, #tpu.memory_space<vmem>>, vector<4x128xi8>
    tpu.vector_store %arg8[%c0_21, %c0_22], %29 {strides = array<i32>} : memref<4x128xi8, #tpu.memory_space<vmem>>, vector<4x128xi8>,
    return
  }
  func.func @transform_0(%arg0: i32) -> (i32, i32) {
    %c0_i32 = arith.constant 0 : i32
    %c0_i32_0 = arith.constant 0 : i32
    return %arg0, %c0_i32 : i32, i32
  }
  func.func @transform_1(%arg0: i32) -> (i32, i32) {
    %c0_i32 = arith.constant 0 : i32
    %c0_i32_0 = arith.constant 0 : i32
    %c0_i32_1 = arith.constant 0 : i32
    return %c0_i32, %c0_i32_0 : i32, i32
  }
  func.func @transform_2(%arg0: i32) -> (i32, i32) {
    %c0_i32 = arith.constant 0 : i32
    %c0_i32_0 = arith.constant 0 : i32
    %c0_i32_1 = arith.constant 0 : i32
    return %c0_i32, %c0_i32_0 : i32, i32
  }
  func.func @transform_3(%arg0: i32) -> (i32, i32) {
    %c0_i32 = arith.constant 0 : i32
    %c0_i32_0 = arith.constant 0 : i32
    %c0_i32_1 = arith.constant 0 : i32
    return %c0_i32, %c0_i32_0 : i32, i32
  }
  func.func @transform_4(%arg0: i32) -> (i32, i32) {
    %c0_i32 = arith.constant 0 : i32
    %c0_i32_0 = arith.constant 0 : i32
    %c0_i32_1 = arith.constant 0 : i32
    return %c0_i32, %c0_i32_0 : i32, i32
  }
  func.func @transform_5(%arg0: i32) -> (i32, i32) {
    %c0_i32 = arith.constant 0 : i32
    %c0_i32_0 = arith.constant 0 : i32
    return %arg0, %c0_i32 : i32, i32
  }
  func.func @transform_6(%arg0: i32) -> (i32, i32) {
    %c0_i32 = arith.constant 0 : i32
    %c0_i32_0 = arith.constant 0 : i32
    return %arg0, %c0_i32 : i32, i32
  }
  func.func @transform_7(%arg0: i32) -> (i32, i32) {
    %c0_i32 = arith.constant 0 : i32
    %c0_i32_0 = arith.constant 0 : i32
    return %arg0, %c0_i32 : i32, i32
  }
}

</mosaic_0001>

<bundles_post_ra>
// kernel: _forward_2d.1
= control target key start
LH: loop header
LB: loop body
LE: loop exit
PB: predicated region body
PF: predicated region fallthrough
CT: control target
= control target key end

     0   :  { %s2753_s1 = inlined_call_operand.vmem [shape: bf16[256,1024], index: 1, kind: input, shape index: {}]   ;;  %s2754_s0 = inlined_call_operand.vmem [shape: f32[4,256], index: 0, kind: input, shape index: {}]   ;;  %s2755_s3 = inlined_call_operand.vmem [shape: bf16[1024,128], index: 3, kind: input, shape index: {}]   ;;  %s2756_s2 = inlined_call_operand.vmem [shape: f32[1,1024], index: 2, kind: input, shape index: {}]   ;;  %s2757_s4 = inlined_call_operand.vmem [shape: f32[1,128], index: 4, kind: input, shape index: {}]   ;;  %s2758_s5 = inlined_call_operand.vmem [shape: f32[4,128], index: 5, kind: output, shape index: {0}]   ;;  %s2759_s7 = inlined_call_operand.vmem [shape: s8[4,128], index: 7, kind: output, shape index: {2}]   ;;  %s2760_s6 = inlined_call_operand.vmem [shape: f32[4,128], index: 6, kind: output, shape index: {1}]  }
   0x1   :  { %v30_v0 = vld [vmem:[%s2753_s1] sm:$0xff]  ;;  %v31_v2 = vld [vmem:[%s2753_s1 + $0x8] sm:$0xff] }
   0x2   :  { %v34_v1 = vld [vmem:[%s2753_s1 + $0x20] sm:$0xff]  ;;  %v35_v4 = vld [vmem:[%s2753_s1 + $0x28] sm:$0xff] }
   0x3   :  { %v1730_v3 = vcombine.high %v30_v0, %v34_v1  ;;  %v1729_v5 = vcombine.low %v30_v0, %v34_v1  ;;  %v38_v6 = vld [vmem:[%s2753_s1 + $0x40] sm:$0xff]  ;;  %v1732_v8 = vcombine.high %v31_v2, %v35_v4  ;;  %v1731_v9 = vcombine.low %v31_v2, %v35_v4  ;;  %v39_v11 = vld [vmem:[%s2753_s1 + $0x48] sm:$0xff] }
   0x4   :  { %v42_v7 = vld [vmem:[%s2753_s1 + $0x60] sm:$0xff]  ;;  %v43_v12 = vld [vmem:[%s2753_s1 + $0x68] sm:$0xff] }
   0x5   :  { %v1738_v10 = vcombine.high %v38_v6, %v42_v7  ;;  %v46_v13 = vld [vmem:[%s2753_s1 + $0x80] sm:$0xff]  ;;  %840 = vmatprep.subr.bf16.mxu0 %v1730_v3  ;;  %v1740_v14 = vcombine.high %v39_v11, %v43_v12  ;;  %v47_v16 = vld [vmem:[%s2753_s1 + $0x88] sm:$0xff]  ;;  %881 = vmatprep.subr.bf16.mxu1 %v1732_v8  ;;  %v1737_v18 = vcombine.low %v38_v6, %v42_v7 }
   0x6   :  { %v50_v15 = vld [vmem:[%s2753_s1 + $0xa0] sm:$0xff]  ;;  %v51_v17 = vld [vmem:[%s2753_s1 + $0xa8] sm:$0xff]  ;;  %841 = vmatpush1.bf16.msra.mxu0 %v1729_v5  ;;  %882 = vmatpush1.bf16.msra.mxu1 %v1731_v9  ;;  %v1739_v19 = vcombine.low %v39_v11, %v43_v12 }
   0x7   :  { %842 = vmatprep.subr.bf16.mxu0 %v1738_v10  ;;  %v1746_v20 = vcombine.high %v46_v13, %v50_v15  ;;  %883 = vmatprep.subr.bf16.mxu1 %v1740_v14  ;;  %v1748_v21 = vcombine.high %v47_v16, %v51_v17  ;;  %v54_v22 = vld [vmem:[%s2753_s1 + $0xc0] sm:$0xff]  ;;  %v55_v24 = vld [vmem:[%s2753_s1 + $0xc8] sm:$0xff]  ;;  %v1745_v26 = vcombine.low %v46_v13, %v50_v15 }
   0x8   :  { %v58_v23 = vld [vmem:[%s2753_s1 + $0xe0] sm:$0xff]  ;;  %v59_v25 = vld [vmem:[%s2753_s1 + $0xe8] sm:$0xff]  ;;  %v1747_v27 = vcombine.low %v47_v16, %v51_v17 }
   0x9   :  { %v1754_v28 = vcombine.high %v54_v22, %v58_v23  ;;  %v1756_v29 = vcombine.high %v55_v24, %v59_v25  ;;  %v62_v30 = vld [vmem:[%s2753_s1 + $0x100] sm:$0xff]  ;;  %v63_v32 = vld [vmem:[%s2753_s1 + $0x108] sm:$0xff]  ;;  %v1753_v34 = vcombine.low %v54_v22, %v58_v23  ;;  %v1755_v35 = vcombine.low %v55_v24, %v59_v25 }
   0xa   :  { %843 = vmatpush1.bf16.msra.mxu0 %v1737_v18  ;;  %884 = vmatpush1.bf16.msra.mxu1 %v1739_v19  ;;  %v66_v31 = vld [vmem:[%s2753_s1 + $0x120] sm:$0xff]  ;;  %v67_v33 = vld [vmem:[%s2753_s1 + $0x128] sm:$0xff] }
   0xb   :  { %844 = vmatprep.subr.bf16.mxu0 %v1746_v20  ;;  %885 = vmatprep.subr.bf16.mxu1 %v1748_v21  ;;  %v1762_v36 = vcombine.high %v62_v30, %v66_v31  ;;  %v1764_v37 = vcombine.high %v63_v32, %v67_v33  ;;  %v70_v38 = vld [vmem:[%s2753_s1 + $0x140] sm:$0xff]  ;;  %v71_v40 = vld [vmem:[%s2753_s1 + $0x148] sm:$0xff]  ;;  %v1761_v42 = vcombine.low %v62_v30, %v66_v31 }
   0xc   :  { %v74_v39 = vld [vmem:[%s2753_s1 + $0x160] sm:$0xff]  ;;  %v75_v41 = vld [vmem:[%s2753_s1 + $0x168] sm:$0xff]  ;;  %v1763_v43 = vcombine.low %v63_v32, %v67_v33 }
   0xd   :  { %v1770_v44 = vcombine.high %v70_v38, %v74_v39  ;;  %v1772_v45 = vcombine.high %v71_v40, %v75_v41  ;;  %v78_v46 = vld [vmem:[%s2753_s1 + $0x180] sm:$0xff]  ;;  %v79_v48 = vld [vmem:[%s2753_s1 + $0x188] sm:$0xff]  ;;  %v1769_v50 = vcombine.low %v70_v38, %v74_v39  ;;  %v1771_v51 = vcombine.low %v71_v40, %v75_v41 }
   0xe   :  { %845 = vmatpush1.bf16.msra.mxu0 %v1745_v26  ;;  %886 = vmatpush1.bf16.msra.mxu1 %v1747_v27  ;;  %v82_v47 = vld [vmem:[%s2753_s1 + $0x1a0] sm:$0xff]  ;;  %v83_v49 = vld [vmem:[%s2753_s1 + $0x1a8] sm:$0xff] }
   0xf   :  { %846 = vmatprep.subr.bf16.mxu0 %v1754_v28  ;;  %887 = vmatprep.subr.bf16.mxu1 %v1756_v29  ;;  %v1778_v52 = vcombine.high %v78_v46, %v82_v47  ;;  %v2208_v53 = vld [vmem:[%s2754_s0] sm:$0xff]  ;;  %v1780_v54 = vcombine.high %v79_v48, %v83_v49  ;;  %v87_v58 = vld [vmem:[%s2753_s1 + $0x1c8] sm:$0xff]  ;;  %v1777_v60 = vcombine.low %v78_v46, %v82_v47 }
  0x10   :  { %v86_v55 = vld [vmem:[%s2753_s1 + $0x1c0] sm:$0xff]  ;;  %v26_v57 = vcombine.high %v2208_v53, %v2208_v53  ;;  %v91_v59 = vld [vmem:[%s2753_s1 + $0x1e8] sm:$0xff]  ;;  %v1779_v62 = vcombine.low %v79_v48, %v83_v49 }
  0x11   :  { %v90_v56 = vld [vmem:[%s2753_s1 + $0x1e0] sm:$0xff]  ;;  %v1788_v0 = vcombine.high %v87_v58, %v91_v59  ;;  %v95_v3 = vld [vmem:[%s2753_s1 + $0x208] sm:$0xff]  ;;  %v1787_v6 = vcombine.low %v87_v58, %v91_v59 }
  0x12   :  { %847 = vmatpush1.bf16.msra.mxu0 %v1753_v34  ;;  %888 = vmatpush1.bf16.msra.mxu1 %v1755_v35  ;;  %v2224_v61 = vpack.c.bf16 %v26_v57, %v26_v57  ;;  %v1786_v63 = vcombine.high %v86_v55, %v90_v56  ;;  %v94_v1 = vld [vmem:[%s2753_s1 + $0x200] sm:$0xff]  ;;  %v99_v4 = vld [vmem:[%s2753_s1 + $0x228] sm:$0xff]  ;;  %v1785_v5 = vcombine.low %v86_v55, %v90_v56 }
  0x13   :  { %848 = vmatprep.subr.bf16.mxu0 %v1762_v36  ;;  %889 = vmatprep.subr.bf16.mxu1 %v1764_v37  ;;  %v98_v2 = vld [vmem:[%s2753_s1 + $0x220] sm:$0xff]  ;;  %v1796_v8 = vcombine.high %v95_v3, %v99_v4  ;;  %v103_v11 = vld [vmem:[%s2753_s1 + $0x248] sm:$0xff]  ;;  %v1795_v14 = vcombine.low %v95_v3, %v99_v4  ;;  %v36_v3 = vld [vmem:[%s2753_s1 + $0x30] sm:$0xff] }
  0x14   :  { %872 = vmatprep.mubr.bf16.mxu0 %v2224_v61  ;;  %913 = vmatprep.mubr.bf16.mxu1 %v2224_v61  ;;  %v1794_v7 = vcombine.high %v94_v1, %v98_v2  ;;  %v102_v9 = vld [vmem:[%s2753_s1 + $0x240] sm:$0xff]  ;;  %v107_v12 = vld [vmem:[%s2753_s1 + $0x268] sm:$0xff]  ;;  %v1793_v13 = vcombine.low %v94_v1, %v98_v2 }
  0x15   :  { %v106_v10 = vld [vmem:[%s2753_s1 + $0x260] sm:$0xff]  ;;  %v1804_v16 = vcombine.high %v103_v11, %v107_v12  ;;  %v111_v19 = vld [vmem:[%s2753_s1 + $0x288] sm:$0xff]  ;;  %v1803_v22 = vcombine.low %v103_v11, %v107_v12  ;;  %v44_v11 = vld [vmem:[%s2753_s1 + $0x70] sm:$0xff] }
  0x16   :  { %849 = vmatpush1.bf16.msra.mxu0 %v1761_v42  ;;  %890 = vmatpush1.bf16.msra.mxu1 %v1763_v43  ;;  %v1802_v15 = vcombine.high %v102_v9, %v106_v10  ;;  %v110_v17 = vld [vmem:[%s2753_s1 + $0x280] sm:$0xff]  ;;  %v115_v20 = vld [vmem:[%s2753_s1 + $0x2a8] sm:$0xff]  ;;  %v1801_v21 = vcombine.low %v102_v9, %v106_v10 }
  0x17   :  { %850 = vmatprep.subr.bf16.mxu0 %v1770_v44  ;;  %891 = vmatprep.subr.bf16.mxu1 %v1772_v45  ;;  %v114_v18 = vld [vmem:[%s2753_s1 + $0x2a0] sm:$0xff]  ;;  %v1812_v24 = vcombine.high %v111_v19, %v115_v20  ;;  %v119_v27 = vld [vmem:[%s2753_s1 + $0x2c8] sm:$0xff]  ;;  %v1811_v30 = vcombine.low %v111_v19, %v115_v20  ;;  %v52_v20 = vld [vmem:[%s2753_s1 + $0xb0] sm:$0xff] }
  0x18   :  { %v1810_v23 = vcombine.high %v110_v17, %v114_v18  ;;  %v118_v25 = vld [vmem:[%s2753_s1 + $0x2c0] sm:$0xff]  ;;  %v123_v28 = vld [vmem:[%s2753_s1 + $0x2e8] sm:$0xff]  ;;  %v1809_v29 = vcombine.low %v110_v17, %v114_v18  ;;  %v48_v17 = vld [vmem:[%s2753_s1 + $0x90] sm:$0xff] }
  0x19   :  { %v122_v26 = vld [vmem:[%s2753_s1 + $0x2e0] sm:$0xff]  ;;  %v1820_v32 = vcombine.high %v119_v27, %v123_v28  ;;  %v127_v35 = vld [vmem:[%s2753_s1 + $0x308] sm:$0xff]  ;;  %v1819_v39 = vcombine.low %v119_v27, %v123_v28  ;;  %v1750_v27 = vcombine.high %v48_v17, %v52_v20  ;;  %v57_v28 = vld [vmem:[%s2753_s1 + $0xd8] sm:$0xff] }
  0x1a   :  { %851 = vmatpush1.bf16.msra.mxu0 %v1769_v50  ;;  %892 = vmatpush1.bf16.msra.mxu1 %v1771_v51  ;;  %v1818_v31 = vcombine.high %v118_v25, %v122_v26  ;;  %v126_v33 = vld [vmem:[%s2753_s1 + $0x300] sm:$0xff]  ;;  %v131_v36 = vld [vmem:[%s2753_s1 + $0x328] sm:$0xff]  ;;  %v1817_v37 = vcombine.low %v118_v25, %v122_v26  ;;  %v60_v25 = vld [vmem:[%s2753_s1 + $0xf0] sm:$0xff] }
  0x1b   :  { %852 = vmatprep.subr.bf16.mxu0 %v1778_v52  ;;  %893 = vmatprep.subr.bf16.mxu1 %v1780_v54  ;;  %v130_v34 = vld [vmem:[%s2753_s1 + $0x320] sm:$0xff]  ;;  %v1828_v42 = vcombine.high %v127_v35, %v131_v36  ;;  %v135_v43 = vld [vmem:[%s2753_s1 + $0x348] sm:$0xff]  ;;  %v1827_v47 = vcombine.low %v127_v35, %v131_v36  ;;  %v65_v36 = vld [vmem:[%s2753_s1 + $0x118] sm:$0xff] }
  0x1c   :  { %v134_v38 = vld [vmem:[%s2753_s1 + $0x340] sm:$0xff]  ;;  %v1826_v40 = vcombine.high %v126_v33, %v130_v34  ;;  %v139_v44 = vld [vmem:[%s2753_s1 + $0x368] sm:$0xff]  ;;  %v1825_v45 = vcombine.low %v126_v33, %v130_v34  ;;  %v68_v33 = vld [vmem:[%s2753_s1 + $0x130] sm:$0xff] }
  0x1d   :  { %v138_v41 = vld [vmem:[%s2753_s1 + $0x360] sm:$0xff]  ;;  %v1836_v50 = vcombine.high %v135_v43, %v139_v44  ;;  %v143_v51 = vld [vmem:[%s2753_s1 + $0x388] sm:$0xff]  ;;  %v1835_v56 = vcombine.low %v135_v43, %v139_v44  ;;  %v73_v43 = vld [vmem:[%s2753_s1 + $0x158] sm:$0xff] }
  0x1e   :  { %853 = vmatpush1.bf16.msra.mxu0 %v1777_v60  ;;  %894 = vmatpush1.bf16.msra.mxu1 %v1779_v62  ;;  %v142_v46 = vld [vmem:[%s2753_s1 + $0x380] sm:$0xff]  ;;  %v1834_v48 = vcombine.high %v134_v38, %v138_v41  ;;  %v147_v52 = vld [vmem:[%s2753_s1 + $0x3a8] sm:$0xff]  ;;  %v1833_v54 = vcombine.low %v134_v38, %v138_v41  ;;  %v77_v44 = vld [vmem:[%s2753_s1 + $0x178] sm:$0xff] }
  0x1f   :  { %854 = vmatprep.subr.bf16.mxu0 %v1786_v63  ;;  %895 = vmatprep.subr.bf16.mxu1 %v1788_v0  ;;  %v146_v49 = vld [vmem:[%s2753_s1 + $0x3a0] sm:$0xff]  ;;  %v1844_v59 = vcombine.high %v143_v51, %v147_v52  ;;  %v151_v60 = vld [vmem:[%s2753_s1 + $0x3c8] sm:$0xff]  ;;  %v32_v0 = vld [vmem:[%s2753_s1 + $0x10] sm:$0xff]  ;;  %v1843_v1 = vcombine.low %v143_v51, %v147_v52 }
  0x20   :  { %v150_v55 = vld [vmem:[%s2753_s1 + $0x3c0] sm:$0xff]  ;;  %v1842_v57 = vcombine.high %v142_v46, %v146_v49  ;;  %v155_v62 = vld [vmem:[%s2753_s1 + $0x3e8] sm:$0xff]  ;;  %v1841_v63 = vcombine.low %v142_v46, %v146_v49  ;;  %v1734_v10 = vcombine.high %v32_v0, %v36_v3  ;;  %v81_v51 = vld [vmem:[%s2753_s1 + $0x198] sm:$0xff] }
  0x21   :  { %v154_v58 = vld [vmem:[%s2753_s1 + $0x3e0] sm:$0xff]  ;;  %v1852_v4 = vcombine.high %v151_v60, %v155_v62  ;;  %v1851_v9 = vcombine.low %v151_v60, %v155_v62  ;;  %v85_v52 = vld [vmem:[%s2753_s1 + $0x1b8] sm:$0xff] }
  0x22   :  { %855 = vmatpush1.bf16.msra.mxu0 %v1785_v5  ;;  %896 = vmatpush1.bf16.msra.mxu1 %v1787_v6  ;;  %v1850_v2 = vcombine.high %v150_v55, %v154_v58  ;;  %v33_v5 = vld [vmem:[%s2753_s1 + $0x18] sm:$0xff] }
  0x23   :  { %856 = vmatprep.subr.bf16.mxu0 %v1794_v7  ;;  %897 = vmatprep.subr.bf16.mxu1 %v1796_v8  ;;  %v37_v6 = vld [vmem:[%s2753_s1 + $0x38] sm:$0xff]  ;;  %v1849_v7 = vcombine.low %v150_v55, %v154_v58  ;;  %v40_v8 = vld [vmem:[%s2753_s1 + $0x50] sm:$0xff]  ;;  %v1775_v58 = vcombine.low %v73_v43, %v77_v44 }
  0x24   :  { %v1736_v12 = vcombine.high %v33_v5, %v37_v6  ;;  %v1735_v18 = vcombine.low %v33_v5, %v37_v6  ;;  %v1742_v19 = vcombine.high %v40_v8, %v44_v11  ;;  %v89_v60 = vld [vmem:[%s2753_s1 + $0x1d8] sm:$0xff] }
  0x25   :  { %v93_v62 = vld [vmem:[%s2753_s1 + $0x1f8] sm:$0xff] }
  0x26   :  { %857 = vmatpush1.bf16.msra.mxu0 %v1793_v13  ;;  %898 = vmatpush1.bf16.msra.mxu1 %v1795_v14  ;;  %v41_v13 = vld [vmem:[%s2753_s1 + $0x58] sm:$0xff]  ;;  %v2347_v14 = vpack.c.bf16 %v2208_v53, %v2208_v53 }
  0x27   :  { %858 = vmatprep.subr.bf16.mxu0 %v1802_v15  ;;  %899 = vmatprep.subr.bf16.mxu1 %v1804_v16  ;;  %v45_v15 = vld [vmem:[%s2753_s1 + $0x78] sm:$0xff]  ;;  %v1733_v16 = vcombine.low %v32_v0, %v36_v3  ;;  %v1783_v3 = vcombine.low %v81_v51, %v85_v52 }
  0x28   :  { %v1744_v53 = vcombine.high %v41_v13, %v45_v15  ;;  %v1743_v26 = vcombine.low %v41_v13, %v45_v15  ;;  %v97_v5 = vld [vmem:[%s2753_s1 + $0x218] sm:$0xff]  ;;  %v108_v13 = vld [vmem:[%s2753_s1 + $0x270] sm:$0xff] }
  0x29   :  { %v101_v6 = vld [vmem:[%s2753_s1 + $0x238] sm:$0xff] }
  0x2a   :  { %859 = vmatpush1.bf16.msra.mxu0 %v1801_v21  ;;  %900 = vmatpush1.bf16.msra.mxu1 %v1803_v22  ;;  %v49_v21 = vld [vmem:[%s2753_s1 + $0x98] sm:$0xff] }
  0x2b   :  { %860 = vmatprep.subr.bf16.mxu0 %v1810_v23  ;;  %901 = vmatprep.subr.bf16.mxu1 %v1812_v24  ;;  %v53_v22 = vld [vmem:[%s2753_s1 + $0xb8] sm:$0xff]  ;;  %v1741_v23 = vcombine.low %v40_v8, %v44_v11  ;;  %v56_v24 = vld [vmem:[%s2753_s1 + $0xd0] sm:$0xff]  ;;  %v1800_v11 = vcombine.high %v97_v5, %v101_v6 }
  0x2c   :  { %v1751_v34 = vcombine.low %v49_v21, %v53_v22  ;;  %v1758_v35 = vcombine.high %v56_v24, %v60_v25  ;;  %v1757_v38 = vcombine.low %v56_v24, %v60_v25  ;;  %v105_v15 = vld [vmem:[%s2753_s1 + $0x258] sm:$0xff] }
  0x2e   :  { %861 = vmatpush1.bf16.msra.mxu0 %v1809_v29  ;;  %902 = vmatpush1.bf16.msra.mxu1 %v1811_v30  ;;  %v61_v29 = vld [vmem:[%s2753_s1 + $0xf8] sm:$0xff]  ;;  %v1752_v30 = vcombine.high %v49_v21, %v53_v22  ;;  %v116_v21 = vld [vmem:[%s2753_s1 + $0x2b0] sm:$0xff] }
  0x2f   :  { %862 = vmatprep.subr.bf16.mxu0 %v1818_v31  ;;  %903 = vmatprep.subr.bf16.mxu1 %v1820_v32  ;;  %v1749_v31 = vcombine.low %v48_v17, %v52_v20  ;;  %v64_v32 = vld [vmem:[%s2753_s1 + $0x110] sm:$0xff]  ;;  %v1759_v41 = vcombine.low %v57_v28, %v61_v29  ;;  %v113_v22 = vld [vmem:[%s2753_s1 + $0x298] sm:$0xff] }
  0x30   :  { %v1765_v46 = vcombine.low %v64_v32, %v68_v33 }
  0x32   :  { %863 = vmatpush1.bf16.msra.mxu0 %v1817_v37  ;;  %904 = vmatpush1.bf16.msra.mxu1 %v1819_v39  ;;  %v1760_v37 = vcombine.high %v57_v28, %v61_v29  ;;  %v72_v39 = vld [vmem:[%s2753_s1 + $0x150] sm:$0xff] }
  0x33   :  { %864 = vmatprep.subr.bf16.mxu0 %v1826_v40  ;;  %905 = vmatprep.subr.bf16.mxu1 %v1828_v42  ;;  %v76_v40 = vld [vmem:[%s2753_s1 + $0x170] sm:$0xff]  ;;  %v1766_v42 = vcombine.high %v64_v32, %v68_v33 }
  0x34   :  { %v1773_v55 = vcombine.low %v72_v39, %v76_v40  ;;  %v120_v28 = vld [vmem:[%s2753_s1 + $0x2d0] sm:$0xff] }
  0x35   :  { %v124_v29 = vld [vmem:[%s2753_s1 + $0x2f0] sm:$0xff] }
  0x36   :  { %865 = vmatpush1.bf16.msra.mxu0 %v1825_v45  ;;  %906 = vmatpush1.bf16.msra.mxu1 %v1827_v47  ;;  %v80_v47 = vld [vmem:[%s2753_s1 + $0x190] sm:$0xff] }
  0x37   :  { %866 = vmatprep.subr.bf16.mxu0 %v1834_v48  ;;  %907 = vmatprep.subr.bf16.mxu1 %v1836_v50  ;;  %v84_v48 = vld [vmem:[%s2753_s1 + $0x1b0] sm:$0xff]  ;;  %v1774_v50 = vcombine.high %v72_v39, %v76_v40  ;;  %v1821_v39 = vcombine.low %v120_v28, %v124_v29 }
  0x38   :  { %v1781_v0 = vcombine.low %v80_v47, %v84_v48 }
  0x3a   :  { %867 = vmatpush1.bf16.msra.mxu0 %v1833_v54  ;;  %908 = vmatpush1.bf16.msra.mxu1 %v1835_v56  ;;  %v1776_v54 = vcombine.high %v73_v43, %v77_v44  ;;  %v88_v56 = vld [vmem:[%s2753_s1 + $0x1d0] sm:$0xff] }
  0x3b   :  { %868 = vmatprep.subr.bf16.mxu0 %v1842_v57  ;;  %909 = vmatprep.subr.bf16.mxu1 %v1844_v59  ;;  %v92_v57 = vld [vmem:[%s2753_s1 + $0x1f0] sm:$0xff]  ;;  %v1782_v59 = vcombine.high %v80_v47, %v84_v48 }
  0x3c   :  { %v1789_v8 = vcombine.low %v88_v56, %v92_v57  ;;  %v136_v43 = vld [vmem:[%s2753_s1 + $0x350] sm:$0xff] }
  0x3d   :  { %v140_v44 = vld [vmem:[%s2753_s1 + $0x370] sm:$0xff] }
  0x3e   :  { %869 = vmatpush1.bf16.msra.mxu0 %v1841_v63  ;;  %910 = vmatpush1.bf16.msra.mxu1 %v1843_v1  ;;  %v1784_v63 = vcombine.high %v81_v51, %v85_v52  ;;  %v96_v1 = vld [vmem:[%s2753_s1 + $0x210] sm:$0xff] }
  0x3f   :  { %870 = vmatprep.subr.bf16.mxu0 %v1850_v2  ;;  %911 = vmatprep.subr.bf16.mxu1 %v1852_v4  ;;  %v100_v2 = vld [vmem:[%s2753_s1 + $0x230] sm:$0xff]  ;;  %v1790_v4 = vcombine.high %v88_v56, %v92_v57  ;;  %v1837_v56 = vcombine.low %v136_v43, %v140_v44 }
  0x40   :  { %v1797_v17 = vcombine.low %v96_v1, %v100_v2  ;;  %v144_v51 = vld [vmem:[%s2753_s1 + $0x390] sm:$0xff] }
  0x41   :  { %v148_v52 = vld [vmem:[%s2753_s1 + $0x3b0] sm:$0xff] }
  0x42   :  { %871 = vmatpush1.bf16.msra.mxu0 %v1849_v7  ;;  %912 = vmatpush1.bf16.msra.mxu1 %v1851_v9  ;;  %v1792_v7 = vcombine.high %v89_v60, %v93_v62  ;;  %v1791_v9 = vcombine.low %v89_v60, %v93_v62  ;;  %v152_v60 = vld [vmem:[%s2753_s1 + $0x3d0] sm:$0xff] }
  0x43   :  { %922 = vmatprep.subr.bf16.mxu0 %v1734_v10  ;;  %963 = vmatprep.subr.bf16.mxu1 %v1736_v12  ;;  %v1798_v10 = vcombine.high %v96_v1, %v100_v2  ;;  %v104_v12 = vld [vmem:[%s2753_s1 + $0x250] sm:$0xff]  ;;  %v1845_v1 = vcombine.low %v144_v51, %v148_v52 }
  0x44   :  { %v1805_v24 = vcombine.low %v104_v12, %v108_v13  ;;  %v156_v62 = vld [vmem:[%s2753_s1 + $0x3f0] sm:$0xff] }
  0x45   :  { %873 = vmatmul.mubr.bf16.vlgmr.msra.gmra.mrb[0].mxu0 %v2347_v14  ;;  %914 = vmatmul.mubr.bf16.vlgmr.msra.gmra.mrb[0].mxu1 %v2347_v14 }
  0x46   :  { %923 = vmatpush1.bf16.msra.mxu0 %v1733_v16  ;;  %964 = vmatpush1.bf16.msra.mxu1 %v1735_v18  ;;  %v109_v16 = vld [vmem:[%s2753_s1 + $0x278] sm:$0xff]  ;;  %v1799_v18 = vcombine.low %v97_v5, %v101_v6  ;;  %v1853_v5 = vcombine.low %v152_v60, %v156_v62 }
  0x47   :  { %924 = vmatprep.subr.bf16.mxu0 %v1742_v19  ;;  %965 = vmatprep.subr.bf16.mxu1 %v1744_v53  ;;  %v1806_v19 = vcombine.high %v104_v12, %v108_v13  ;;  %v1808_v20 = vcombine.high %v105_v15, %v109_v16  ;;  %v112_v53 = vld [vmem:[%s2753_s1 + $0x290] sm:$0xff]  ;;  %v1807_v25 = vcombine.low %v105_v15, %v109_v16  ;;  %v2017_v12 = vld [vmem:[%s2755_s3 + $0xc8] sm:$0xff]  }
  0x48   :  { %954 = vmatprep.mubr.bf16.mxu0 %v2224_v61  ;;  %995 = vmatprep.mubr.bf16.mxu1 %v2224_v61  ;;  %v69_v61 = vld [vmem:[%s2753_s1 + $0x138] sm:$0xff]  ;;  %v1813_v32 = vcombine.low %v112_v53, %v116_v21  ;;  %v2018_v13 = vld [vmem:[%s2755_s3 + $0x8] sm:$0xff]   ;;  %v2020_v16 = vld [vmem:[%s2755_s3 + $0x50] sm:$0xff]  }
  0x49   :  { %v1768_v45 = vcombine.high %v65_v36, %v69_v61  ;;  %v1767_v49 = vcombine.low %v65_v36, %v69_v61  ;;  %v128_v36 = vld [vmem:[%s2753_s1 + $0x310] sm:$0xff]  ;;  %v2019_v15 = vld [vmem:[%s2755_s3 + $0x88] sm:$0xff]  }
  0x4a   :  { %925 = vmatpush1.bf16.msra.mxu0 %v1741_v23  ;;  %966 = vmatpush1.bf16.msra.mxu1 %v1743_v26  ;;  %v117_v23 = vld [vmem:[%s2753_s1 + $0x2b8] sm:$0xff]  ;;  %v1814_v26 = vcombine.high %v112_v53, %v116_v21  ;;  %v132_v61 = vld [vmem:[%s2753_s1 + $0x330] sm:$0xff] }
  0x4b   :  { %926 = vmatprep.subr.bf16.mxu0 %v1750_v27  ;;  %967 = vmatprep.subr.bf16.mxu1 %v1752_v30  ;;  %v1816_v27 = vcombine.high %v113_v22, %v117_v23  ;;  %v121_v30 = vld [vmem:[%s2753_s1 + $0x2d8] sm:$0xff]  ;;  %v1815_v33 = vcombine.low %v113_v22, %v117_v23  ;;  %v1829_v47 = vcombine.low %v128_v36, %v132_v61  ;;  %v2028_v22 = vld [vmem:[%s2755_s3 + $0x60] sm:$0xff]  }
  0x4c   :  { %v2026_v53 = vld [vmem:[%s2755_s3 + $0x18] sm:$0xff]   ;;  %v2029_v23 = vld [vmem:[%s2755_s3 + $0xe0] sm:$0xff]  }
  0x4d   :  { %v2027_v21 = vld [vmem:[%s2755_s3 + $0x98] sm:$0xff]  }
  0x4e   :  { %927 = vmatpush1.bf16.msra.mxu0 %v1749_v31  ;;  %968 = vmatpush1.bf16.msra.mxu1 %v1751_v34  ;;  %v125_v31 = vld [vmem:[%s2753_s1 + $0x2f8] sm:$0xff]  ;;  %v1822_v34 = vcombine.high %v120_v28, %v124_v29  ;;  %v2034_v28 = vld [vmem:[%s2755_s3 + $0x28] sm:$0xff]  }
  0x4f   :  { %928 = vmatprep.subr.bf16.mxu0 %v1758_v35  ;;  %969 = vmatprep.subr.bf16.mxu1 %v1760_v37  ;;  %v1824_v35 = vcombine.high %v121_v30, %v125_v31  ;;  %v129_v37 = vld [vmem:[%s2753_s1 + $0x318] sm:$0xff]  ;;  %v1823_v40 = vcombine.low %v121_v30, %v125_v31  ;;  %v2035_v29 = vld [vmem:[%s2755_s3 + $0xa8] sm:$0xff]   ;;  %v2036_v30 = vld [vmem:[%s2755_s3 + $0x70] sm:$0xff]  }
  0x50   :  { %v2037_v31 = vld [vmem:[%s2755_s3 + $0xf0] sm:$0xff]  }
  0x52   :  { %929 = vmatpush1.bf16.msra.mxu0 %v1757_v38  ;;  %970 = vmatpush1.bf16.msra.mxu1 %v1759_v41  ;;  %v133_v38 = vld [vmem:[%s2753_s1 + $0x338] sm:$0xff]  ;;  %v1830_v41 = vcombine.high %v128_v36, %v132_v61 }
  0x53   :  { %930 = vmatprep.subr.bf16.mxu0 %v1766_v42  ;;  %971 = vmatprep.subr.bf16.mxu1 %v1768_v45  ;;  %v1832_v42 = vcombine.high %v129_v37, %v133_v38  ;;  %v137_v45 = vld [vmem:[%s2753_s1 + $0x358] sm:$0xff]  ;;  %v1831_v48 = vcombine.low %v129_v37, %v133_v38  ;;  %v2044_v37 = vld [vmem:[%s2755_s3 + $0x140] sm:$0xff]  }
  0x54   :  { %v2042_v36 = vld [vmem:[%s2755_s3 + $0x38] sm:$0xff]   ;;  %v2045_v38 = vld [vmem:[%s2755_s3 + $0x1c0] sm:$0xff]  }
  0x55   :  { %v2043_v61 = vld [vmem:[%s2755_s3 + $0xb8] sm:$0xff]  }
  0x56   :  { %931 = vmatpush1.bf16.msra.mxu0 %v1765_v46  ;;  %972 = vmatpush1.bf16.msra.mxu1 %v1767_v49  ;;  %v141_v46 = vld [vmem:[%s2753_s1 + $0x378] sm:$0xff]  ;;  %v1838_v49 = vcombine.high %v136_v43, %v140_v44 }
  0x57   :  { %932 = vmatprep.subr.bf16.mxu0 %v1774_v50  ;;  %973 = vmatprep.subr.bf16.mxu1 %v1776_v54  ;;  %v1840_v50 = vcombine.high %v137_v45, %v141_v46  ;;  %v145_v54 = vld [vmem:[%s2753_s1 + $0x398] sm:$0xff]  ;;  %v1839_v57 = vcombine.low %v137_v45, %v141_v46 }
  0x5a   :  { %933 = vmatpush1.bf16.msra.mxu0 %v1773_v55  ;;  %974 = vmatpush1.bf16.msra.mxu1 %v1775_v58  ;;  %v149_v55 = vld [vmem:[%s2753_s1 + $0x3b8] sm:$0xff]  ;;  %v1846_v58 = vcombine.high %v144_v51, %v148_v52 }
  0x5b   :  { %934 = vmatprep.subr.bf16.mxu0 %v1782_v59  ;;  %975 = vmatprep.subr.bf16.mxu1 %v1784_v63  ;;  %v1848_v59 = vcombine.high %v145_v54, %v149_v55  ;;  %v153_v63 = vld [vmem:[%s2753_s1 + $0x3d8] sm:$0xff]  ;;  %v1847_v2 = vcombine.low %v145_v54, %v149_v55 }
  0x5e   :  { %935 = vmatpush1.bf16.msra.mxu0 %v1781_v0  ;;  %976 = vmatpush1.bf16.msra.mxu1 %v1783_v3  ;;  %v157_v0 = vld [vmem:[%s2753_s1 + $0x3f8] sm:$0xff]  ;;  %v1854_v3 = vcombine.high %v152_v60, %v156_v62 }
  0x5f   :  { %936 = vmatprep.subr.bf16.mxu0 %v1790_v4  ;;  %977 = vmatprep.subr.bf16.mxu1 %v1792_v7  ;;  %v1856_v4 = vcombine.high %v153_v63, %v157_v0  ;;  %v1855_v6 = vcombine.low %v153_v63, %v157_v0  ;;  %v2012_v7 = vld [vmem:[%s2755_s3 + $0x40] sm:$0xff]  }
  0x62   :  { %937 = vmatpush1.bf16.msra.mxu0 %v1789_v8  ;;  %978 = vmatpush1.bf16.msra.mxu1 %v1791_v9  ;;  %v2013_v8 = vld [vmem:[%s2755_s3 + $0xc0] sm:$0xff]  }
  0x63   :  { %938 = vmatprep.subr.bf16.mxu0 %v1798_v10  ;;  %979 = vmatprep.subr.bf16.mxu1 %v1800_v11  ;;  %v2014_v9 = vld [vmem:[%s2755_s3] sm:$0xff]   ;;  %v2016_v11 = vld [vmem:[%s2755_s3 + $0x48] sm:$0xff]  }
  0x64   :  { %v2015_v10 = vld [vmem:[%s2755_s3 + $0x80] sm:$0xff]  }
  0x66   :  { %939 = vmatpush1.bf16.msra.mxu0 %v1797_v17  ;;  %980 = vmatpush1.bf16.msra.mxu1 %v1799_v18  ;;  %v2022_v17 = vld [vmem:[%s2755_s3 + $0x10] sm:$0xff]  }
  0x67   :  { %940 = vmatprep.subr.bf16.mxu0 %v1806_v19  ;;  %981 = vmatprep.subr.bf16.mxu1 %v1808_v20  ;;  %v2023_v18 = vld [vmem:[%s2755_s3 + $0x90] sm:$0xff]   ;;  %v2024_v19 = vld [vmem:[%s2755_s3 + $0x58] sm:$0xff]  }
  0x68   :  { %v2025_v20 = vld [vmem:[%s2755_s3 + $0xd8] sm:$0xff]  }
  0x6a   :  { %941 = vmatpush1.bf16.msra.mxu0 %v1805_v24  ;;  %982 = vmatpush1.bf16.msra.mxu1 %v1807_v25  ;;  %v2030_v24 = vld [vmem:[%s2755_s3 + $0x20] sm:$0xff]  }
  0x6b   :  { %942 = vmatprep.subr.bf16.mxu0 %v1814_v26  ;;  %983 = vmatprep.subr.bf16.mxu1 %v1816_v27  ;;  %v2031_v25 = vld [vmem:[%s2755_s3 + $0xa0] sm:$0xff]   ;;  %v2032_v26 = vld [vmem:[%s2755_s3 + $0x68] sm:$0xff]  }
  0x6c   :  { %v2033_v27 = vld [vmem:[%s2755_s3 + $0xe8] sm:$0xff]  }
  0x6e   :  { %943 = vmatpush1.bf16.msra.mxu0 %v1813_v32  ;;  %984 = vmatpush1.bf16.msra.mxu1 %v1815_v33  ;;  %v2038_v32 = vld [vmem:[%s2755_s3 + $0x30] sm:$0xff]  }
  0x6f   :  { %944 = vmatprep.subr.bf16.mxu0 %v1822_v34  ;;  %985 = vmatprep.subr.bf16.mxu1 %v1824_v35  ;;  %v2039_v33 = vld [vmem:[%s2755_s3 + $0xb0] sm:$0xff]   ;;  %v2040_v34 = vld [vmem:[%s2755_s3 + $0x78] sm:$0xff]  }
  0x70   :  { %v2041_v35 = vld [vmem:[%s2755_s3 + $0xf8] sm:$0xff]  }
  0x72   :  { %945 = vmatpush1.bf16.msra.mxu0 %v1821_v39  ;;  %986 = vmatpush1.bf16.msra.mxu1 %v1823_v40  ;;  %v160_v39 = vlaneseq }
  0x73   :  { %946 = vmatprep.subr.bf16.mxu0 %v1830_v41  ;;  %987 = vmatprep.subr.bf16.mxu1 %v1832_v42  ;;  %v2634_v42 = vld [vmem:[%s2756_s2] sm:$0xff] }
  0x74   :  { %v2628_v40 = vshrl.u32 %v160_v39, 7 }
  0x76   :  { %947 = vmatpush1.bf16.msra.mxu0 %v1829_v47  ;;  %988 = vmatpush1.bf16.msra.mxu1 %v1831_v48  ;;  %v162_v41 = vsub.s32 0, %v2628_v40  ;;  %v170_v43 = vsub.s32 2, %v2628_v40  ;;  %v166_v44 = vsub.s32 1, %v2628_v40  ;;  %v174_v45 = vsub.s32 3, %v2628_v40 }
  0x77   :  { %948 = vmatprep.subr.bf16.mxu0 %v1838_v49  ;;  %989 = vmatprep.subr.bf16.mxu1 %v1840_v50  ;;  %v190_v39 = vsub.s32 7, %v2628_v40 }
  0x78   :  { %v163_v46 = vrot.slane %v2634_v42, %v162_v41  ;;  %v171_v47 = vrot.slane %v2634_v42, %v170_v43  ;;  %v167_v48 = vrot.slane %v2634_v42, %v166_v44  ;;  %v175_v49 = vrot.slane %v2634_v42, %v174_v45 }
  0x79   :  { %v191_v45 = vrot.slane %v2634_v42, %v190_v39 }
  0x7a   :  { %949 = vmatpush1.bf16.msra.mxu0 %v1837_v56  ;;  %990 = vmatpush1.bf16.msra.mxu1 %v1839_v57 }
  0x7b   :  { %950 = vmatprep.subr.bf16.mxu0 %v1846_v58  ;;  %991 = vmatprep.subr.bf16.mxu1 %v1848_v59 }
  0x7e   :  { %951 = vmatpush1.bf16.msra.mxu0 %v1845_v1  ;;  %992 = vmatpush1.bf16.msra.mxu1 %v1847_v2 }
  0x7f   :  { %952 = vmatprep.subr.bf16.mxu0 %v1854_v3  ;;  %993 = vmatprep.subr.bf16.mxu1 %v1856_v4 }
  0x82   :  { %953 = vmatpush1.bf16.msra.mxu0 %v1853_v5  ;;  %994 = vmatpush1.bf16.msra.mxu1 %v1855_v6 }
  0x83   :  { %1922 = vmatprep.subr.bf16.mxu0 %v2012_v7  ;;  %1944 = vmatprep.subr.bf16.mxu1 %v2013_v8  ;;  %v2046_v7 = vld [vmem:[%s2755_s3 + $0x100] sm:$0xff]  }
  0x85   :  { %955 = vmatmul.mubr.bf16.vlgmr.msra.gmra.mrb[4].mxu0 %v2347_v14  ;;  %996 = vmatmul.mubr.bf16.vlgmr.msra.gmra.mrb[4].mxu1 %v2347_v14  ;;  %v2021_v14 = vld [vmem:[%s2755_s3 + $0xd0] sm:$0xff]  }
  0x86   :  { %1923 = vmatpush3.bf16.msra.mxu0 %v2014_v9  ;;  %1945 = vmatpush3.bf16.msra.mxu1 %v2015_v10  ;;  %v2047_v9 = vld [vmem:[%s2755_s3 + $0x180] sm:$0xff]   ;;  %v2048_v10 = vld [vmem:[%s2755_s3 + $0x148] sm:$0xff]  }
  0x87   :  { %1924 = vmatprep.subr.bf16.mxu0 %v2016_v11  ;;  %1946 = vmatprep.subr.bf16.mxu1 %v2017_v12  ;;  %v2049_v11 = vld [vmem:[%s2755_s3 + $0x1c8] sm:$0xff]  }
  0x88   :  { %v2050_v12 = vld [vmem:[%s2755_s3 + $0x108] sm:$0xff]  }
  0x8a   :  { %1925 = vmatpush3.bf16.msra.mxu0 %v2018_v13  ;;  %1947 = vmatpush3.bf16.msra.mxu1 %v2019_v15  ;;  %v2051_v13 = vld [vmem:[%s2755_s3 + $0x188] sm:$0xff]   ;;  %v2052_v15 = vld [vmem:[%s2755_s3 + $0x150] sm:$0xff]  }
  0x8b   :  { %1926 = vmatprep.subr.bf16.mxu0 %v2020_v16  ;;  %1948 = vmatprep.subr.bf16.mxu1 %v2021_v14  ;;  %v2053_v16 = vld [vmem:[%s2755_s3 + $0x1d0] sm:$0xff]  }
  0x8c   :  { %v2054_v14 = vld [vmem:[%s2755_s3 + $0x110] sm:$0xff]  }
  0x8e   :  { %1927 = vmatpush3.bf16.msra.mxu0 %v2022_v17  ;;  %1949 = vmatpush3.bf16.msra.mxu1 %v2023_v18  ;;  %v2055_v17 = vld [vmem:[%s2755_s3 + $0x190] sm:$0xff]   ;;  %v2056_v18 = vld [vmem:[%s2755_s3 + $0x158] sm:$0xff]  }
  0x8f   :  { %1928 = vmatprep.subr.bf16.mxu0 %v2024_v19  ;;  %1950 = vmatprep.subr.bf16.mxu1 %v2025_v20  ;;  %v2057_v19 = vld [vmem:[%s2755_s3 + $0x1d8] sm:$0xff]  }
  0x90   :  { %v2058_v20 = vld [vmem:[%s2755_s3 + $0x118] sm:$0xff]  }
  0x92   :  { %1929 = vmatpush3.bf16.msra.mxu0 %v2026_v53  ;;  %1951 = vmatpush3.bf16.msra.mxu1 %v2027_v21  ;;  %v2059_v53 = vld [vmem:[%s2755_s3 + $0x198] sm:$0xff]   ;;  %v2060_v21 = vld [vmem:[%s2755_s3 + $0x160] sm:$0xff]  }
  0x93   :  { %1930 = vmatprep.subr.bf16.mxu0 %v2028_v22  ;;  %1952 = vmatprep.subr.bf16.mxu1 %v2029_v23  ;;  %v2061_v22 = vld [vmem:[%s2755_s3 + $0x1e0] sm:$0xff]  }
  0x94   :  { %v2062_v23 = vld [vmem:[%s2755_s3 + $0x120] sm:$0xff]  }
  0x96   :  { %1931 = vmatpush3.bf16.msra.mxu0 %v2030_v24  ;;  %1953 = vmatpush3.bf16.msra.mxu1 %v2031_v25  ;;  %v2063_v24 = vld [vmem:[%s2755_s3 + $0x1a0] sm:$0xff]   ;;  %v2064_v25 = vld [vmem:[%s2755_s3 + $0x168] sm:$0xff]  }
  0x97   :  { %1932 = vmatprep.subr.bf16.mxu0 %v2032_v26  ;;  %1954 = vmatprep.subr.bf16.mxu1 %v2033_v27  ;;  %v2065_v26 = vld [vmem:[%s2755_s3 + $0x1e8] sm:$0xff]  }
  0x98   :  { %v2066_v27 = vld [vmem:[%s2755_s3 + $0x128] sm:$0xff]  }
  0x9a   :  { %1933 = vmatpush3.bf16.msra.mxu0 %v2034_v28  ;;  %1955 = vmatpush3.bf16.msra.mxu1 %v2035_v29  ;;  %v2067_v28 = vld [vmem:[%s2755_s3 + $0x1a8] sm:$0xff]   ;;  %v2068_v29 = vld [vmem:[%s2755_s3 + $0x170] sm:$0xff]  }
  0x9b   :  { %1934 = vmatprep.subr.bf16.mxu0 %v2036_v30  ;;  %1956 = vmatprep.subr.bf16.mxu1 %v2037_v31  ;;  %v2069_v30 = vld [vmem:[%s2755_s3 + $0x1f0] sm:$0xff]  }
  0x9c   :  { %v2070_v31 = vld [vmem:[%s2755_s3 + $0x130] sm:$0xff]  }
  0x9e   :  { %1935 = vmatpush3.bf16.msra.mxu0 %v2038_v32  ;;  %1957 = vmatpush3.bf16.msra.mxu1 %v2039_v33  ;;  %v2071_v32 = vld [vmem:[%s2755_s3 + $0x1b0] sm:$0xff]   ;;  %v2072_v33 = vld [vmem:[%s2755_s3 + $0x178] sm:$0xff]  }
  0x9f   :  { %1936 = vmatprep.subr.bf16.mxu0 %v2040_v34  ;;  %1958 = vmatprep.subr.bf16.mxu1 %v2041_v35  ;;  %v2073_v34 = vld [vmem:[%s2755_s3 + $0x1f8] sm:$0xff]  }
  0xa0   :  { %v2074_v35 = vld [vmem:[%s2755_s3 + $0x138] sm:$0xff]  }
  0xa2   :  { %1937 = vmatpush3.bf16.msra.mxu0 %v2042_v36  ;;  %1959 = vmatpush3.bf16.msra.mxu1 %v2043_v61  ;;  %v2075_v36 = vld [vmem:[%s2755_s3 + $0x1b8] sm:$0xff]   ;;  %v178_v61 = vsub.s32 4, %v2628_v40 }
  0xa3   :  { %1966 = vmatprep.subr.bf16.mxu0 %v2044_v37  ;;  %1988 = vmatprep.subr.bf16.mxu1 %v2045_v38  ;;  %v186_v37 = vsub.s32 6, %v2628_v40  ;;  %v182_v38 = vsub.s32 5, %v2628_v40 }
  0xa4   :  { %v179_v41 = vrot.slane %v2634_v42, %v178_v61 }
  0xa5   :  { %v187_v43 = vrot.slane %v2634_v42, %v186_v37  ;;  %v183_v44 = vrot.slane %v2634_v42, %v182_v38 }
 0x118   :  { %v874_v50 = vpop.f32.mrb[0].mxu0  ;;  %v915_v52 = vpop.f32.mrb[0].mxu1 }
 0x119   :  { %v875_v51 = vadd.f32 %v874_v50, %v163_v46  ;;  %v876_v54 = vpop.f32.mrb[1].mxu0  ;;  %v916_v55 = vadd.f32 %v915_v52, %v171_v47  ;;  %v917_v57 = vpop.f32.mrb[1].mxu1 }
 0x11a   :  { %v877_v56 = vadd.f32 %v876_v54, %v167_v48  ;;  %v878_v58 = vpop.f32.mrb[2].mxu0  ;;  %v918_v60 = vadd.f32 %v917_v57, %v175_v49  ;;  %v919_v62 = vpop.f32.mrb[2].mxu1 }
 0x11b   :  { %v1004_v59 = vmax.f32 %v875_v51, 0.0  ;;  %v879_v63 = vpop.f32.mrb[3].mxu0  ;;  %v1006_v0 = vmax.f32 %v916_v55, 0.0  ;;  %v920_v2 = vpop.f32.mrb[3].mxu1 }
 0x11c   :  { %v1005_v1 = vmax.f32 %v877_v56, 0.0  ;;  %v1007_v4 = vmax.f32 %v918_v60, 0.0 }
 0x11d   :  { %v1012_v3 = vpack.c.bf16 %v1004_v59, %v1004_v59  ;;  %v1014_v5 = vpack.c.bf16 %v1006_v0, %v1006_v0 }
 0x11e   :  { %v1013_v6 = vpack.c.bf16 %v1005_v1, %v1005_v1  ;;  %v1015_v8 = vpack.c.bf16 %v1007_v4, %v1007_v4  ;;  %v1857_v4 = vld [vmem:[%s2757_s4] ss:$0 sm:$0xff] }
 0x120   :  { %1571 = vmatprep.mubr.bf16.mxu0 %v1013_v6  ;;  %1611 = vmatprep.mubr.bf16.mxu1 %v1015_v8 }
 0x121   :  { %1572 = vmatmul.mubr.bf16.vlgmr.msra.gmra.mrb[8].mxu0 %v1012_v3  ;;  %1612 = vmatmul.mubr.bf16.vlgmr.msra.gmra.mrb[8].mxu1 %v1014_v5 }
 0x122   :  { %1967 = vmatpush3.bf16.msra.mxu0 %v2046_v7  ;;  %1989 = vmatpush3.bf16.msra.mxu1 %v2047_v9 }
 0x123   :  { %1968 = vmatprep.subr.bf16.mxu0 %v2048_v10  ;;  %1990 = vmatprep.subr.bf16.mxu1 %v2049_v11 }
 0x126   :  { %1969 = vmatpush3.bf16.msra.mxu0 %v2050_v12  ;;  %1991 = vmatpush3.bf16.msra.mxu1 %v2051_v13 }
 0x127   :  { %1970 = vmatprep.subr.bf16.mxu0 %v2052_v15  ;;  %1992 = vmatprep.subr.bf16.mxu1 %v2053_v16 }
 0x12a   :  { %1971 = vmatpush3.bf16.msra.mxu0 %v2054_v14  ;;  %1993 = vmatpush3.bf16.msra.mxu1 %v2055_v17 }
 0x12b   :  { %1972 = vmatprep.subr.bf16.mxu0 %v2056_v18  ;;  %1994 = vmatprep.subr.bf16.mxu1 %v2057_v19 }
 0x12e   :  { %1973 = vmatpush3.bf16.msra.mxu0 %v2058_v20  ;;  %1995 = vmatpush3.bf16.msra.mxu1 %v2059_v53 }
 0x12f   :  { %1974 = vmatprep.subr.bf16.mxu0 %v2060_v21  ;;  %1996 = vmatprep.subr.bf16.mxu1 %v2061_v22 }
 0x132   :  { %1975 = vmatpush3.bf16.msra.mxu0 %v2062_v23  ;;  %1997 = vmatpush3.bf16.msra.mxu1 %v2063_v24 }
 0x133   :  { %1976 = vmatprep.subr.bf16.mxu0 %v2064_v25  ;;  %1998 = vmatprep.subr.bf16.mxu1 %v2065_v26 }
 0x136   :  { %1977 = vmatpush3.bf16.msra.mxu0 %v2066_v27  ;;  %1999 = vmatpush3.bf16.msra.mxu1 %v2067_v28  ;;  %v2080_v27 = vmov 0.0  }
 0x137   :  { %1978 = vmatprep.subr.bf16.mxu0 %v2068_v29  ;;  %2000 = vmatprep.subr.bf16.mxu1 %v2069_v30 }
 0x13a   :  { %1979 = vmatpush3.bf16.msra.mxu0 %v2070_v31  ;;  %2001 = vmatpush3.bf16.msra.mxu1 %v2071_v32 }
 0x13b   :  { %1980 = vmatprep.subr.bf16.mxu0 %v2072_v33  ;;  %2002 = vmatprep.subr.bf16.mxu1 %v2073_v34 }
 0x13e   :  { %1981 = vmatpush3.bf16.msra.mxu0 %v2074_v35  ;;  %2003 = vmatpush3.bf16.msra.mxu1 %v2075_v36 }
 0x158   :  { %v956_v46 = vpop.f32.mrb[4].mxu0  ;;  %v997_v48 = vpop.f32.mrb[4].mxu1 }
 0x159   :  { %v957_v47 = vadd.f32 %v956_v46, %v179_v41  ;;  %v958_v49 = vpop.f32.mrb[5].mxu0  ;;  %v998_v50 = vadd.f32 %v997_v48, %v187_v43  ;;  %v999_v52 = vpop.f32.mrb[5].mxu1 }
 0x15a   :  { %v959_v51 = vadd.f32 %v958_v49, %v183_v44  ;;  %v960_v54 = vpop.f32.mrb[6].mxu0  ;;  %v1000_v56 = vadd.f32 %v999_v52, %v191_v45  ;;  %v1001_v57 = vpop.f32.mrb[6].mxu1 }
 0x15b   :  { %v1008_v55 = vmax.f32 %v957_v47, 0.0  ;;  %v961_v40 = vpop.f32.mrb[7].mxu0  ;;  %v1010_v58 = vmax.f32 %v998_v50, 0.0  ;;  %v1002_v60 = vpop.f32.mrb[7].mxu1 }
 0x15c   :  { %v1009_v59 = vmax.f32 %v959_v51, 0.0  ;;  %v1011_v62 = vmax.f32 %v1000_v56, 0.0 }
 0x15d   :  { %v1018_v63 = vpack.c.bf16 %v1010_v58, %v1010_v58  ;;  %v1016_v1 = vpack.c.bf16 %v1008_v55, %v1008_v55 }
 0x15e   :  { %v1017_v0 = vpack.c.bf16 %v1009_v59, %v1009_v59  ;;  %v1019_v42 = vpack.c.bf16 %v1011_v62, %v1011_v62 }
 0x160   :  { %1651 = vmatprep.mubr.bf16.mxu0 %v1017_v0  ;;  %1691 = vmatprep.mubr.bf16.mxu1 %v1019_v42 }
 0x161   :  { %1652 = vmatmul.mubr.bf16.vlgmr.msra.gmra.mrb[12].mxu0 %v1016_v1  ;;  %1692 = vmatmul.mubr.bf16.vlgmr.msra.gmra.mrb[12].mxu1 %v1018_v63 }
 0x1f4   :  { %v1938_v2 = vpop.f32.mrb[8].mxu0  ;;  %v1960_v3 = vpop.f32.mrb[8].mxu1 }
 0x1f5   :  { %v1939_v5 = vpop.f32.mrb[9].mxu0  ;;  %v1961_v7 = vpop.f32.mrb[9].mxu1 }
 0x1f6   :  { %v1940_v6 = vadd.f32 %v1939_v5, %v1938_v2  ;;  %v1941_v8 = vpop.f32.mrb[10].mxu0  ;;  %v1962_v9 = vadd.f32 %v1961_v7, %v1960_v3  ;;  %v1963_v10 = vpop.f32.mrb[10].mxu1 }
 0x1f7   :  { %v1942_v11 = vpop.f32.mrb[11].mxu0  ;;  %v1964_v13 = vpop.f32.mrb[11].mxu1 }
 0x1f8   :  { %v1574_v12 = vadd.f32 %v1940_v6, %v1857_v4 }
 0x1fa   :  { %v1614_v15 = vadd.f32 %v1962_v9, %v1574_v12 }
 0x234   :  { %v1982_v16 = vpop.f32.mrb[12].mxu0  ;;  %v2004_v14 = vpop.f32.mrb[12].mxu1 }
 0x235   :  { %v1983_v17 = vpop.f32.mrb[13].mxu0  ;;  %v2005_v19 = vpop.f32.mrb[13].mxu1 }
 0x236   :  { %v1984_v18 = vadd.f32 %v1983_v17, %v1982_v16  ;;  %v1985_v20 = vpop.f32.mrb[14].mxu0  ;;  %v2006_v53 = vadd.f32 %v2005_v19, %v2004_v14  ;;  %v2007_v21 = vpop.f32.mrb[14].mxu1 }
 0x237   :  { %v1986_v22 = vpop.f32.mrb[15].mxu0  ;;  %v2008_v24 = vpop.f32.mrb[15].mxu1 }
 0x238   :  { %v1654_v23 = vadd.f32 %v1984_v18, %v1614_v15 }
 0x23a   :  { %v1694_v25 = vadd.f32 %v2006_v53, %v1654_v23 }
 0x23c   :  { %1699 = vst [vmem:[%s2758_s5] sm:$0xf] %v1694_v25  ;;  %v1700_v26 = vsub.f32 0.0, %v1694_v25  ;;  %vm1707_vm0 = vcmp.gt.f32.partialorder %v1694_v25, 0.0 }
 0x23d   :  { %v1708_v28 = vsel %vm1707_vm0, 1.0, %v2080_v27 }
 0x23e   :  { %v1701_v29 = vmul.f32 1.442695, %v1700_v26  ;;  %v1709_v30 = vtrunc.f32 %v1708_v28 }
 0x240   :  { %2076 = vpow2.f32 %v1701_v29  ;;  %v1710_v31 = vpack.c.f32.eXmY %v1709_v30, %v1709_v30, 312 }
 0x242   :  { %v1714_v32 = vpack.c.b8 %v1710_v31, %v1710_v31 }
 0x244   :  { %1716 = vst [vmem:[%s2759_s7] sm:$0x1] %v1714_v32 }
 0x24a   :  { %v2077_v33 = vpop.eup %2076 }
 0x24b   :  { %v1703_v34 = vadd.f32 1.0, %v2077_v33 }
 0x24d   :  { %2078 = vrcp.f32 %v1703_v34 }
 0x257   :  { %v2079_v35 = vpop.eup %2078 }
 0x258   :  { %1706 = vst [vmem:[%s2760_s6] sm:$0xf] %v2079_v35 }

</bundles_post_ra>
